<compile_context>
chip_gen: v7x
topology: tpu7x:2x2x1
jax: 0.10.0
libtpu: 0.0.40
codegen_flags: <defaults>
</compile_context>

<pallas_src>
import functools

import jax
import jax.numpy as jnp
from jax import lax
from jax.experimental import pallas as pl
from jax.experimental.pallas import tpu as pltpu


def _flash_head_kernel(xq_ref, xkv_ref, wq_ref, wkv_ref, o_ref,
                       q_sc, m_sc, l_sc, acc_sc,
                       *, scale, hp, tq, tkv, dot_dtype):
    qi = pl.program_id(1)
    ki = pl.program_id(2)
    n_kv = pl.num_programs(2)

    @pl.when(ki == 0)
    def _init():
        # Q projection for this q tile, computed once and reused across all KV tiles.
        # The 1/sqrt(head_size) scale is folded in here (touches T*H elems, not T*T).
        q = jnp.dot(xq_ref[...], wq_ref[...], preferred_element_type=jnp.float32)
        q_sc[...] = q * scale
        m_sc[...] = jnp.full_like(m_sc, -jnp.inf)
        l_sc[...] = jnp.zeros_like(l_sc)
        acc_sc[...] = jnp.zeros_like(acc_sc)

    # Causal block skip: this KV tile only contributes if its first key index is
    # <= the last query index of the current q tile.
    @pl.when(ki * tkv <= qi * tq + (tq - 1))
    def _compute():
        # Fused K|V projection: one MXU push with N = 2*Hp (lane-dense).
        kv = jnp.dot(xkv_ref[...], wkv_ref[...], preferred_element_type=jnp.float32)
        k = kv[:, :hp].astype(dot_dtype)        # (TKV, Hp), zero beyond true head_size
        v = kv[:, hp:].astype(dot_dtype)        # (TKV, Hp)
        q = q_sc[...].astype(dot_dtype)         # (TQ, Hp)

        # s = q @ k^T — padded head columns are zero in both q and k, so contracting
        # over Hp equals contracting over the true head_size.
        s = lax.dot_general(q, k, (((1,), (1,)), ((), ())),
                            preferred_element_type=jnp.float32)        # (TQ, TKV)

        row = qi * tq + lax.broadcasted_iota(jnp.int32, (tq, tkv), 0)
        col = ki * tkv + lax.broadcasted_iota(jnp.int32, (tq, tkv), 1)
        s = jnp.where(col <= row, s, -jnp.inf)                          # causal mask

        # Online softmax update.
        m_prev = m_sc[...]
        m_new = jnp.maximum(m_prev, jnp.max(s, axis=-1, keepdims=True))
        alpha = jnp.exp(m_prev - m_new)
        p = jnp.exp(s - m_new)
        l_sc[...] = alpha * l_sc[...] + jnp.sum(p, axis=-1, keepdims=True)
        acc_sc[...] = alpha * acc_sc[...] + jnp.dot(
            p.astype(dot_dtype), v, preferred_element_type=jnp.float32)
        m_sc[...] = m_new

    @pl.when(ki == n_kv - 1)
    def _finalize():
        # Normalize the (TQ, Hp) accumulator with a (TQ, 1) reciprocal.
        inv_l = pl.reciprocal(l_sc[...], approx=False)
        o_ref[...] = (acc_sc[...] * inv_l).astype(o_ref.dtype)


def head_forward(x, wk, wq, wv):
    """x: (B, T, C); wk/wq/wv: (C, H). Returns (B, T, H)."""
    B, T, C = x.shape
    H = wk.shape[1]
    lane = 128
    hp = ((H + lane - 1) // lane) * lane            # head_size padded to lane width

    # Lane-pad the projection weights with zeros; fuse K|V into one (C, 2*Hp) weight.
    pad = ((0, 0), (0, hp - H))
    wq_p = jnp.pad(wq, pad)
    wkv_p = jnp.concatenate([jnp.pad(wk, pad), jnp.pad(wv, pad)], axis=1)

    # Tile sizes: full T for short sequences, otherwise 128-aligned flash tiles.
    # 128x128 tiles keep VMEM use tiny even under v7x's 64 MiB / 32 MiB-scoped budget.
    tq = T if T <= 128 else 128
    tkv = tq
    assert T % tq == 0, "sequence length must be a multiple of the 128-wide tile"
    n_q = T // tq
    n_kv = T // tkv

    kernel = functools.partial(
        _flash_head_kernel,
        scale=float(H) ** -0.5, hp=hp, tq=tq, tkv=tkv, dot_dtype=x.dtype)

    out_padded = pl.pallas_call(
        kernel,
        out_shape=jax.ShapeDtypeStruct((B, T, hp), x.dtype),
        grid_spec=pltpu.PrefetchScalarGridSpec(
            num_scalar_prefetch=0,
            grid=(B, n_q, n_kv),
            in_specs=[
                # x, tiled by q rows ...
                pl.BlockSpec((pl.Squeezed(), tq, C), lambda b, qi, ki: (b, qi, 0)),
                # ... and the same array tiled by kv rows.
                pl.BlockSpec((pl.Squeezed(), tkv, C), lambda b, qi, ki: (b, ki, 0)),
                pl.BlockSpec((C, hp), lambda b, qi, ki: (0, 0)),        # wq (padded)
                pl.BlockSpec((C, 2 * hp), lambda b, qi, ki: (0, 0)),    # wk|wv (padded)
            ],
            out_specs=pl.BlockSpec((pl.Squeezed(), tq, hp),
                                   lambda b, qi, ki: (b, qi, 0)),
            scratch_shapes=[
                pltpu.VMEM((tq, hp), jnp.float32),   # scaled q tile
                pltpu.VMEM((tq, 1), jnp.float32),    # running max  m
                pltpu.VMEM((tq, 1), jnp.float32),    # running sum  l
                pltpu.VMEM((tq, hp), jnp.float32),   # output accumulator
            ]),
        compiler_params=pltpu.CompilerParams(
            dimension_semantics=("parallel", "parallel", "arbitrary"),
            vmem_limit_bytes=32 * 1024 * 1024),
    )(x, x, wq_p, wkv_p)

    return out_padded[..., :H]


def head_reference(x, wk, wq, wv):
    """Pure-JAX reference mirroring the PyTorch forward exactly."""
    k = x @ wk
    q = x @ wq
    v = x @ wv
    wei = q @ jnp.swapaxes(k, -2, -1) * (k.shape[-1] ** -0.5)
    T = x.shape[1]
    tril = jnp.tril(jnp.ones((T, T), dtype=x.dtype))
    wei = jnp.where(tril == 0, -jnp.inf, wei)
    wei = jax.nn.softmax(wei, axis=-1)
    return wei @ v


if __name__ == "__main__":
    # Small shapes consistent with the module: B=2, T=block_size=8, C=n_embd=32, head_size=16.
    B, T, C, H = 2, 8, 32, 16
    key = jax.random.PRNGKey(0)
    kx, kk, kq, kv = jax.random.split(key, 4)

    x = jax.random.normal(kx, (B, T, C), dtype=jnp.float32)
    # Deterministic parameter init (Linear without bias): stored (C, H) so kernel does x @ W.
    wk = jax.random.normal(kk, (C, H), dtype=jnp.float32) * (C ** -0.5)
    wq = jax.random.normal(kq, (C, H), dtype=jnp.float32) * (C ** -0.5)
    wv = jax.random.normal(kv, (C, H), dtype=jnp.float32) * (C ** -0.5)

    out = head_forward(x, wk, wq, wv)
    out = jax.block_until_ready(out)

    ref = head_reference(x, wk, wq, wv)
    assert out.shape == (B, T, H)
    assert jnp.allclose(out, ref, atol=1e-5, rtol=1e-5)

    print("KERNEL_OK")
</pallas_src>

<mosaic_0001>
module attributes {stable_mosaic.version = 11 : i64} {
  func.func @_flash_head_kernel(%arg0: i32, %arg1: i32, %arg2: i32, %arg3: memref<1x8x32xf32, #tpu.memory_space<vmem>>, %arg4: memref<1x8x32xf32, #tpu.memory_space<vmem>>, %arg5: memref<32x128xf32, #tpu.memory_space<vmem>>, %arg6: memref<32x256xf32, #tpu.memory_space<vmem>>, %arg7: memref<1x8x128xf32, #tpu.memory_space<vmem>>, %arg8: memref<8x128xf32, #tpu.memory_space<vmem>>, %arg9: memref<8x1xf32, #tpu.memory_space<vmem>>, %arg10: memref<8x1xf32, #tpu.memory_space<vmem>>, %arg11: memref<8x128xf32, #tpu.memory_space<vmem>>) attributes {dimension_semantics = [#tpu.dimension_semantics<parallel>, #tpu.dimension_semantics<parallel>, #tpu.dimension_semantics<arbitrary>], iteration_bounds = array<i64: 2, 1, 1>, scalar_prefetch = 0 : i64, scratch_operands = 4 : i64, tpu.core_type = #tpu.core_type<tc>, window_params = [{transform_indices = @transform_0, window_bounds = array<i64: 1, 8, 32>}, {transform_indices = @transform_1, window_bounds = array<i64: 1, 8, 32>}, {pipeline_mode = #tpu.pipeline_mode<synchronous>, transform_indices = @transform_2, window_bounds = array<i64: 32, 128>}, {pipeline_mode = #tpu.pipeline_mode<synchronous>, transform_indices = @transform_3, window_bounds = array<i64: 32, 256>}, {transform_indices = @transform_4, window_bounds = array<i64: 1, 8, 128>}]} {
    %c0_i32 = arith.constant 0 : i32
    %0 = arith.cmpi eq, %arg2, %c0_i32 : i32
    %1 = arith.extui %0 : i1 to i32
    %c0_i32_0 = arith.constant 0 : i32
    %2 = arith.cmpi ne, %1, %c0_i32_0 : i32
    scf.if %2 {
      %c0 = arith.constant 0 : index
      %c0_5 = arith.constant 0 : index
      %c0_6 = arith.constant 0 : index
      %12 = vector.load %arg3[%c0, %c0_5, %c0_6] : memref<1x8x32xf32, #tpu.memory_space<vmem>>, vector<1x8x32xf32>
      %13 = vector.shape_cast %12 : vector<1x8x32xf32> to vector<8x32xf32>
      %c0_7 = arith.constant 0 : index
      %c0_8 = arith.constant 0 : index
      %14 = vector.load %arg5[%c0_7, %c0_8] : memref<32x128xf32, #tpu.memory_space<vmem>>, vector<32x128xf32>
      %cst = arith.constant dense<0.000000e+00> : vector<8x128xf32>
      %15 = tpu.matmul %13, %14, %cst {dimension_numbers = #tpu.dot_dimension_numbers<[1], [0], [0], [1], [0, 0, 1, 1], [], []>} : vector<8x32xf32>, vector<32x128xf32>, vector<8x128xf32> -> vector<8x128xf32>
      %cst_9 = arith.constant 2.500000e-01 : f32
      %16 = vector.broadcast %cst_9 : f32 to vector<8x128xf32>
      %17 = arith.mulf %15, %16 : vector<8x128xf32>
      %c0_10 = arith.constant 0 : index
      %c0_11 = arith.constant 0 : index
      %18 = vector.load %arg8[%c0_10, %c0_11] : memref<8x128xf32, #tpu.memory_space<vmem>>, vector<8x128xf32>
      tpu.vector_store %arg8[%c0_10, %c0_11], %17 {strides = array<i32>} : memref<8x128xf32, #tpu.memory_space<vmem>>, vector<8x128xf32>,
      %cst_12 = arith.constant 0xFF800000 : f32
      %19 = vector.broadcast %cst_12 : f32 to vector<8x1xf32>
      %c0_13 = arith.constant 0 : index
      %c0_14 = arith.constant 0 : index
      %20 = vector.load %arg9[%c0_13, %c0_14] : memref<8x1xf32, #tpu.memory_space<vmem>>, vector<8x1xf32>
      tpu.vector_store %arg9[%c0_13, %c0_14], %19 {strides = array<i32>} : memref<8x1xf32, #tpu.memory_space<vmem>>, vector<8x1xf32>,
      %cst_15 = arith.constant 0.000000e+00 : f32
      %21 = vector.broadcast %cst_15 : f32 to vector<8x1xf32>
      %c0_16 = arith.constant 0 : index
      %c0_17 = arith.constant 0 : index
      %22 = vector.load %arg10[%c0_16, %c0_17] : memref<8x1xf32, #tpu.memory_space<vmem>>, vector<8x1xf32>
      tpu.vector_store %arg10[%c0_16, %c0_17], %21 {strides = array<i32>} : memref<8x1xf32, #tpu.memory_space<vmem>>, vector<8x1xf32>,
      %cst_18 = arith.constant 0.000000e+00 : f32
      %23 = vector.broadcast %cst_18 : f32 to vector<8x128xf32>
      %c0_19 = arith.constant 0 : index
      %c0_20 = arith.constant 0 : index
      %24 = vector.load %arg11[%c0_19, %c0_20] : memref<8x128xf32, #tpu.memory_space<vmem>>, vector<8x128xf32>
      tpu.vector_store %arg11[%c0_19, %c0_20], %23 {strides = array<i32>} : memref<8x128xf32, #tpu.memory_space<vmem>>, vector<8x128xf32>,
    } else {
    }
    %c8_i32 = arith.constant 8 : i32
    %3 = arith.muli %arg2, %c8_i32 : i32
    %c8_i32_1 = arith.constant 8 : i32
    %4 = arith.muli %arg1, %c8_i32_1 : i32
    %c7_i32 = arith.constant 7 : i32
    %5 = arith.addi %4, %c7_i32 : i32
    %6 = arith.cmpi sle, %3, %5 : i32
    %7 = arith.extui %6 : i1 to i32
    %c0_i32_2 = arith.constant 0 : i32
    %8 = arith.cmpi ne, %7, %c0_i32_2 : i32
    scf.if %8 {
      %c0 = arith.constant 0 : index
      %c0_5 = arith.constant 0 : index
      %c0_6 = arith.constant 0 : index
      %12 = vector.load %arg4[%c0, %c0_5, %c0_6] : memref<1x8x32xf32, #tpu.memory_space<vmem>>, vector<1x8x32xf32>
      %13 = vector.shape_cast %12 : vector<1x8x32xf32> to vector<8x32xf32>
      %c0_7 = arith.constant 0 : index
      %c0_8 = arith.constant 0 : index
      %14 = vector.load %arg6[%c0_7, %c0_8] : memref<32x256xf32, #tpu.memory_space<vmem>>, vector<32x256xf32>
      %cst = arith.constant dense<0.000000e+00> : vector<8x256xf32>
      %15 = tpu.matmul %13, %14, %cst {dimension_numbers = #tpu.dot_dimension_numbers<[1], [0], [0], [1], [0, 0, 1, 1], [], []>} : vector<8x32xf32>, vector<32x256xf32>, vector<8x256xf32> -> vector<8x256xf32>
      %16 = vector.extract_strided_slice %15 {offsets = [0, 0], sizes = [8, 128], strides = [1, 1]} : vector<8x256xf32> to vector<8x128xf32>
      %17 = vector.extract_strided_slice %15 {offsets = [0, 128], sizes = [8, 128], strides = [1, 1]} : vector<8x256xf32> to vector<8x128xf32>
      %c0_9 = arith.constant 0 : index
      %c0_10 = arith.constant 0 : index
      %18 = vector.load %arg8[%c0_9, %c0_10] : memref<8x128xf32, #tpu.memory_space<vmem>>, vector<8x128xf32>
      %cst_11 = arith.constant dense<0.000000e+00> : vector<8x8xf32>
      %19 = tpu.matmul %18, %16, %cst_11 {dimension_numbers = #tpu.dot_dimension_numbers<[1], [1], [0], [0], [0, 0, 1, 0], [], []>} : vector<8x128xf32>, vector<8x128xf32>, vector<8x8xf32> -> vector<8x8xf32>
      %c8_i32_12 = arith.constant 8 : i32
      %20 = arith.muli %arg1, %c8_i32_12 : i32
      %21 = tpu.iota {dimensions = array<i32: 0>} : vector<8x8xi32>
      %22 = vector.broadcast %20 : i32 to vector<8x8xi32>
      %23 = arith.addi %22, %21 : vector<8x8xi32>
      %c8_i32_13 = arith.constant 8 : i32
      %24 = arith.muli %arg2, %c8_i32_13 : i32
      %25 = tpu.iota {dimensions = array<i32: 1>} : vector<8x8xi32>
      %26 = vector.broadcast %24 : i32 to vector<8x8xi32>
      %27 = arith.addi %26, %25 : vector<8x8xi32>
      %28 = arith.cmpi sle, %27, %23 : vector<8x8xi32>
      %cst_14 = arith.constant 0xFF800000 : f32
      %29 = vector.broadcast %cst_14 : f32 to vector<8x8xf32>
      %30 = arith.select %28, %19, %29 : vector<8x8xi1>, vector<8x8xf32>
      %c0_15 = arith.constant 0 : index
      %c0_16 = arith.constant 0 : index
      %31 = vector.load %arg9[%c0_15, %c0_16] : memref<8x1xf32, #tpu.memory_space<vmem>>, vector<8x1xf32>
      %cst_17 = arith.constant dense<0xFF800000> : vector<8xf32>
      %32 = vector.multi_reduction <maximumf>, %30, %cst_17 [1] : vector<8x8xf32> to vector<8xf32>
      %33 = vector.shape_cast %32 : vector<8xf32> to vector<8x1xf32>
      %34 = arith.maximumf %31, %33 : vector<8x1xf32>
      %35 = arith.subf %31, %34 : vector<8x1xf32>
      %36 = math.exp %35 : vector<8x1xf32>
      %37 = vector.broadcast %34 : vector<8x1xf32> to vector<8x8xf32>
      %38 = arith.subf %30, %37 : vector<8x8xf32>
      %39 = math.exp %38 : vector<8x8xf32>
      %c0_18 = arith.constant 0 : index
      %c0_19 = arith.constant 0 : index
      %40 = vector.load %arg10[%c0_18, %c0_19] : memref<8x1xf32, #tpu.memory_space<vmem>>, vector<8x1xf32>
      %41 = arith.mulf %36, %40 : vector<8x1xf32>
      %cst_20 = arith.constant dense<0.000000e+00> : vector<8xf32>
      %42 = vector.multi_reduction <add>, %39, %cst_20 [1] : vector<8x8xf32> to vector<8xf32>
      %43 = vector.shape_cast %42 : vector<8xf32> to vector<8x1xf32>
      %44 = arith.addf %41, %43 : vector<8x1xf32>
      %c0_21 = arith.constant 0 : index
      %c0_22 = arith.constant 0 : index
      %45 = vector.load %arg10[%c0_21, %c0_22] : memref<8x1xf32, #tpu.memory_space<vmem>>, vector<8x1xf32>
      tpu.vector_store %arg10[%c0_21, %c0_22], %44 {strides = array<i32>} : memref<8x1xf32, #tpu.memory_space<vmem>>, vector<8x1xf32>,
      %c0_23 = arith.constant 0 : index
      %c0_24 = arith.constant 0 : index
      %46 = vector.load %arg11[%c0_23, %c0_24] : memref<8x128xf32, #tpu.memory_space<vmem>>, vector<8x128xf32>
      %47 = vector.broadcast %36 : vector<8x1xf32> to vector<8x128xf32>
      %48 = arith.mulf %47, %46 : vector<8x128xf32>
      %cst_25 = arith.constant dense<0.000000e+00> : vector<8x128xf32>
      %49 = tpu.matmul %39, %17, %cst_25 {dimension_numbers = #tpu.dot_dimension_numbers<[1], [0], [0], [1], [0, 0, 1, 1], [], []>} : vector<8x8xf32>, vector<8x128xf32>, vector<8x128xf32> -> vector<8x128xf32>
      %50 = arith.addf %48, %49 : vector<8x128xf32>
      %c0_26 = arith.constant 0 : index
      %c0_27 = arith.constant 0 : index
      %51 = vector.load %arg11[%c0_26, %c0_27] : memref<8x128xf32, #tpu.memory_space<vmem>>, vector<8x128xf32>
      tpu.vector_store %arg11[%c0_26, %c0_27], %50 {strides = array<i32>} : memref<8x128xf32, #tpu.memory_space<vmem>>, vector<8x128xf32>,
      %c0_28 = arith.constant 0 : index
      %c0_29 = arith.constant 0 : index
      %52 = vector.load %arg9[%c0_28, %c0_29] : memref<8x1xf32, #tpu.memory_space<vmem>>, vector<8x1xf32>
      tpu.vector_store %arg9[%c0_28, %c0_29], %34 {strides = array<i32>} : memref<8x1xf32, #tpu.memory_space<vmem>>, vector<8x1xf32>,
    } else {
    }
    %c0_i32_3 = arith.constant 0 : i32
    %9 = arith.cmpi eq, %arg2, %c0_i32_3 : i32
    %10 = arith.extui %9 : i1 to i32
    %c0_i32_4 = arith.constant 0 : i32
    %11 = arith.cmpi ne, %10, %c0_i32_4 : i32
    scf.if %11 {
      %c0 = arith.constant 0 : index
      %c0_5 = arith.constant 0 : index
      %12 = vector.load %arg10[%c0, %c0_5] : memref<8x1xf32, #tpu.memory_space<vmem>>, vector<8x1xf32>
      %13 = tpu.reciprocal %12 : vector<8x1xf32> -> vector<8x1xf32>
      %c0_6 = arith.constant 0 : index
      %c0_7 = arith.constant 0 : index
      %14 = vector.load %arg11[%c0_6, %c0_7] : memref<8x128xf32, #tpu.memory_space<vmem>>, vector<8x128xf32>
      %15 = vector.broadcast %13 : vector<8x1xf32> to vector<8x128xf32>
      %16 = arith.mulf %14, %15 : vector<8x128xf32>
      %c0_8 = arith.constant 0 : index
      %c0_9 = arith.constant 0 : index
      %c0_10 = arith.constant 0 : index
      %17 = vector.load %arg7[%c0_8, %c0_9, %c0_10] : memref<1x8x128xf32, #tpu.memory_space<vmem>>, vector<1x8x128xf32>
      %18 = vector.shape_cast %17 : vector<1x8x128xf32> to vector<8x128xf32>
      %19 = vector.shape_cast %16 : vector<8x128xf32> to vector<1x8x128xf32>
      tpu.vector_store %arg7[%c0_8, %c0_9, %c0_10], %19 {strides = array<i32>} : memref<1x8x128xf32, #tpu.memory_space<vmem>>, vector<1x8x128xf32>,
    } else {
    }
    return
  }
  func.func @transform_0(%arg0: i32, %arg1: i32, %arg2: i32) -> (i32, i32, i32) {
    %c0_i32 = arith.constant 0 : i32
    %c0_i32_0 = arith.constant 0 : i32
    return %arg0, %arg1, %c0_i32 : i32, i32, i32
  }
  func.func @transform_1(%arg0: i32, %arg1: i32, %arg2: i32) -> (i32, i32, i32) {
    %c0_i32 = arith.constant 0 : i32
    %c0_i32_0 = arith.constant 0 : i32
    return %arg0, %arg2, %c0_i32 : i32, i32, i32
  }
  func.func @transform_2(%arg0: i32, %arg1: i32, %arg2: i32) -> (i32, i32) {
    %c0_i32 = arith.constant 0 : i32
    %c0_i32_0 = arith.constant 0 : i32
    %c0_i32_1 = arith.constant 0 : i32
    return %c0_i32, %c0_i32_0 : i32, i32
  }
  func.func @transform_3(%arg0: i32, %arg1: i32, %arg2: i32) -> (i32, i32) {
    %c0_i32 = arith.constant 0 : i32
    %c0_i32_0 = arith.constant 0 : i32
    %c0_i32_1 = arith.constant 0 : i32
    return %c0_i32, %c0_i32_0 : i32, i32
  }
  func.func @transform_4(%arg0: i32, %arg1: i32, %arg2: i32) -> (i32, i32, i32) {
    %c0_i32 = arith.constant 0 : i32
    %c0_i32_0 = arith.constant 0 : i32
    return %arg0, %arg1, %c0_i32 : i32, i32, i32
  }
}

</mosaic_0001>

<bundles_post_ra>
// kernel: tpu_custom_call.1
= control target key start
LH: loop header
LB: loop body
LE: loop exit
PB: predicated region body
PF: predicated region fallthrough
CT: control target
= control target key end

     0   :  { %s1555_s0 = inlined_call_operand.hbm [shape: f32[2,8,32], index: 0, kind: input, shape index: {}]   ;;  %s1556_s1 = inlined_call_operand.hbm [shape: f32[2,8,32], index: 1, kind: input, shape index: {}]   ;;  %s1557_s2 = inlined_call_operand.hbm [shape: f32[32,128], index: 2, kind: input, shape index: {}]   ;;  %s1558_s3 = inlined_call_operand.hbm [shape: f32[32,256], index: 3, kind: input, shape index: {}]   ;;  %s1559_s4 = inlined_call_operand.hbm [shape: f32[2,8,128], index: 4, kind: output, shape index: {}]  }
   0x1   :  { %1565 = sst [smem:[#allocation21_spill]] %s1557_s2 }
   0x2   :  { %1566 = sst [smem:[#allocation22_spill]] %s1558_s3 }
   0x3   :  { %9 = vsyncpa [#allocation7], 0 }
   0x4   :  { %11 = vsyncpa [#allocation7 + $0x1], 0 }
   0x5   :  { %12 = vsyncpa [#allocation10], 0 }
   0x6   :  { %14 = vsyncpa [#allocation10 + $0x1], 0 }
   0x7   :  { %15 = vsyncpa [#allocation13], 0 }
   0x8   :  { %16 = vsyncpa [#allocation8], 0 }
   0x9   :  { %18 = vsyncpa [#allocation8 + $0x1], 0  ;;  %s1252_s15 = smov 0   ;;  %s1254_s16 = smov 0  }
   0xa   :  { %s1256_s17 = smov 0   ;;  %s1258_s18 = smov 0  }
   0xb   :  { %s1260_s19 = smov 0   ;;  %s1262_s20 = smov 0  }
   0xc LB: > { %s1283_s21 = sadd.s32 4294967295, %s1211_s20   ;;  %s830_s22 = sadd.s32 4294967294, %s1211_s20   ;;  %s1211_s20 = sphi %s1262_s20, %s24_s20   ;;  %s1207_s19 = sphi %s1260_s19, %s1591_s19   ;;  %s1203_s18 = sphi %s1258_s18, %s1590_s18   ;;  %s1199_s17 = sphi %s1256_s17, %s1589_s17   ;;  %s1195_s16 = sphi %s1254_s16, %s1588_s16   ;;  %s1191_s15 = sphi %s1252_s15, %s1587_s15  }
   0xd   : > { %p65_p0 = scmp.ne.s32.totalorder %s1195_s16, %s1191_s15  ;;  %p1560_p1 = scmp.eq.s32.totalorder %s1283_s21, 0 }
   0xe   : > { %p167_p3 = scmp.eq.s32.totalorder %s830_s22, 1  ;;  %p831_p5 = scmp.ge.s32.totalorder %s1211_s20, 1 }
   0xf   : > { %p1292_p4 = por %p1560_p1, %p65_p0  ;;  %p174_p7 = scmp.lt.s32.totalorder %s1211_s20, 3 }
  0x10   : > { %p1297_p6 = por %p167_p3, %p65_p0  ;;  %s1213_s26 = smov [#allocation11]  }
  0x11   : > { %s1567_s23 = scalar_select %p1292_p4, 1, 0 }
  0x12   : > { %s1568_s24 = scalar_select %p1297_p6, 1, 0 }
  0x13   : > { %p1302_p8 = pnand %p831_p5, %p174_p7  ;;  %s186_s27 = sshll.u32 %s1213_s26, 4  ;;  %s1306_s27 = int_to_ptr.vmem [resolvable:$true] %s186_s27 }
  0x14   : > { %s1214_s29 = smov [#allocation12]   ;;  %s1571_s2 = sld [smem:[#allocation21_spill]] }
  0x15   : > { %s1569_s25 = scalar_select %p1302_p8, 1, 0 }
  0x16   : > { %p910_p9 = pneg %p1302_p8  ;;  %s199_s30 = sshll.u32 %s1214_s29, 4  ;;  %s1317_s30 = int_to_ptr.vmem [resolvable:$true] %s199_s30 }
  0x18   : > { %p1313_p11 = pnand %p910_p9, %p1560_p1 }
  0x1a   : > { %s1001_s7 = scalar_lea.hbm %s1571_s2, 512  ;;  %p1003_p13 = pneg %p1313_p11 }
  0x1b   : > { %p1002_p12 = scmp.ne.s32.totalorder %s1571_s2, %s1001_s7  ;;  %p1008_p5 = scmp.lt.u32.totalorder %s1001_s7, %s1571_s2 }
  0x1d   : > { %p1004_p0 = pnand %p1003_p13, %p1002_p12 }
  0x1f   : > { %p1005_p3 = pneg %p1004_p0 }
  0x21   : > { %p1010_p7 = pnand %p1008_p5, %p1005_p3 }
  0x23   : > { %1013 = shalt.err (!%p1010_p7)
}
  0x24   : > { %s1014_s12 = scalar_lea.vmem %s1306_s27, 512  ;;  %p1022_p2 = scmp.lt.s32.totalorder %s1306_s27, %s1306_s27 }
  0x25   : > { %p1015_p9 = scmp.ne.s32.totalorder %s1306_s27, %s1014_s12  ;;  %p1023_p12 = scmp.lt.s32.totalorder %s1014_s12, %s1014_s12 }
  0x27   : > { %p1017_p10 = pnand %p1015_p9, %p1003_p13  ;;  %p1024_p0 = por %p1023_p12, %p1022_p2 }
  0x29   : > { %p1018_p1 = pneg %p1017_p10 }
  0x2b   : > { %p1025_p6 = pnand %p1024_p0, %p1018_p1 }
  0x2d   : > { %1028 = shalt.err (!%p1025_p6)
}
  0x2e   : > { %s1215_s13 = smov 128   ;;  %s1216_s14 = smov 8  }
  0x2f   : > { %913 = dma.hbm_to_vmem [thread:$0]  (!%p1313_p11), %s1571_s2, 512, %s1306_s27, [#allocation10], %s1215_s13, %s1215_s13, %s1216_s14  }
  0x30   : > { %s1572_s3 = sld [smem:[#allocation22_spill]] }
  0x36   : > { %s1029_s6 = scalar_lea.hbm %s1572_s3, 1024 }
  0x37   : > { %p1030_p2 = scmp.ne.s32.totalorder %s1572_s3, %s1029_s6  ;;  %p1036_p10 = scmp.lt.u32.totalorder %s1029_s6, %s1572_s3 }
  0x39   : > { %p1032_p1 = pnand %p1030_p2, %p1003_p13 }
  0x3b   : > { %p1033_p6 = pneg %p1032_p1 }
  0x3d   : > { %p1038_p3 = pnand %p1036_p10, %p1033_p6 }
  0x3f   : > { %1041 = shalt.err (!%p1038_p3)
}
  0x40   : > { %s1042_s27 = scalar_lea.vmem %s1317_s30, 1024  ;;  %p1050_p12 = scmp.lt.s32.totalorder %s1317_s30, %s1317_s30 }
  0x41   : > { %p1043_p5 = scmp.ne.s32.totalorder %s1317_s30, %s1042_s27  ;;  %p1051_p0 = scmp.lt.s32.totalorder %s1042_s27, %s1042_s27 }
  0x43   : > { %p1045_p7 = pnand %p1043_p5, %p1003_p13  ;;  %p1052_p2 = por %p1051_p0, %p1050_p12 }
  0x45   : > { %p1046_p9 = pneg %p1045_p7 }
  0x47   : > { %p1053_p1 = pnand %p1052_p2, %p1046_p9 }
  0x49   : > { %1056 = shalt.err (!%p1053_p1)
}
  0x4a   : > { %s1217_s11 = smov 256   ;;  %s1218_s12 = smov 16  }
  0x4b   : > { %916 = dma.hbm_to_vmem [thread:$0]  (!%p1313_p11), %s1572_s3, 1024, %s1317_s30, [#allocation13], %s1217_s11, %s1217_s11, %s1218_s12  }
  0x4c   : > { %s43_s22 = sadd.s32 1, %s1207_s19  ;;  %s52_s26 = sadd.s32 1, %s1199_s17 }
  0x4d   : > { %p45_p13 = scmp.ge.s32.totalorder %s43_s22, 2  ;;  %p59_p6 = scmp.ne.s32.totalorder %s1199_s17, %s1195_s16 }
  0x4e   : > { %p60_p10 = scmp.eq.s32.totalorder %s1211_s20, 0  ;;  %p930_p3 = scmp.lt.s32.totalorder %s1211_s20, 2 }
  0x4f   : > { %s1593_s22 = smov (%p45_p13, %s43_s22), 0  ;;  %p1574_p7 = scmp.eq.s32.totalorder %s1283_s21, 1 }
  0x50   : > { %1573 = sst [smem:[#allocation20_spill]] %s1593_s22  ;;  %p61_p5 = por %p60_p10, %p59_p6 }
  0x51   : > { %p1381_p9 = por %p1574_p7, %p59_p6  ;;  %s47_s28 = ssub.s32 %s1207_s19, %s1593_s22 }
  0x52   : > { %s213_s5 = sand.u32 1, %s1199_s17   ;;  %p50_p12 = scmp.eq.s32.totalorder %s47_s28, 0 }
  0x53   : > { %s1575_s29 = scalar_select %p1381_p9, 1, 0 }
  0x54   : > { %s1388_s30 = sshll.u32 %s213_s5, 3  ;;  %s836_s6 = sshll.u32 %s1207_s19, 7 }
  0x55   : > { %s1392_s7 = scalar_select %p50_p12, %s1199_s17, %s52_s26  }
  0x56   : > { %s1397_s10 = scalar_lea.hbm %s1555_s0, %s836_s6  ;;  %s217_s27 = scalar_lea.vmem [#allocation6], %s1388_s30 }
  0x57   : > { %s225_s11 = sshll.u32 %s217_s27, 4  ;;  %p1402_p11 = pnand %p930_p3, %p61_p5  ;;  %s1406_s11 = int_to_ptr.vmem [resolvable:$true] %s225_s11 }
  0x58   : > { %s1411_s26 = scalar_lea.hbm %s1556_s1, %s836_s6  ;;  %s214_s28 = scalar_lea.sflag [#allocation7], %s213_s5 }
  0x59   : > { %s1057_s8 = scalar_lea.hbm %s1397_s10, 128  ;;  %p1059_p2 = pneg %p1402_p11 }
  0x5a   : > { %p1058_p0 = scmp.ne.s32.totalorder %s1397_s10, %s1057_s8  ;;  %s1062_s2 = scalar_lea.hbm %s1555_s0, 256 }
  0x5b   : > { %p1063_p6 = scmp.lt.u32.totalorder %s1397_s10, %s1555_s0  ;;  %p1064_p10 = scmp.lt.u32.totalorder %s1062_s2, %s1057_s8 }
  0x5c   : > { %p1060_p1 = pnand %p1059_p2, %p1058_p0  ;;  %p1066_p5 = scmp.lt.u32.totalorder %s1057_s8, %s1397_s10 }
  0x5d   : > { %p1065_p3 = por %p1064_p10, %p1063_p6 }
  0x5e   : > { %p1061_p13 = pneg %p1060_p1 }
  0x5f   : > { %p1067_p7 = por %p1066_p5, %p1065_p3 }
  0x61   : > { %p1068_p12 = pnand %p1067_p7, %p1061_p13 }
  0x63   : > { %1071 = shalt.err (!%p1068_p12)
}
  0x64   : > { %s1072_s5 = scalar_lea.vmem %s1406_s11, 128  ;;  %s1219_s6 = smov [#allocation6]  }
  0x65   : > { %p1073_p0 = scmp.ne.s32.totalorder %s1406_s11, %s1072_s5  ;;  %s1077_s13 = sshll.u32 %s1219_s6, 4  ;;  %s1078_s13 = int_to_ptr.vmem [resolvable:$false] %s1077_s13 }
  0x66   : > { %s1079_s3 = scalar_lea.vmem %s1078_s13, 256  ;;  %p1080_p4 = scmp.lt.s32.totalorder %s1406_s11, %s1078_s13 }
  0x67   : > { %p1075_p1 = pnand %p1073_p0, %p1059_p2  ;;  %p1081_p6 = scmp.lt.s32.totalorder %s1079_s3, %s1072_s5 }
  0x69   : > { %p1076_p9 = pneg %p1075_p1  ;;  %p1082_p10 = por %p1081_p6, %p1080_p4 }
  0x6b   : > { %p1083_p3 = pnand %p1082_p10, %p1076_p9 }
  0x6d   : > { %1086 = shalt.err (!%p1083_p3)
}
  0x6e   : > { %920 = dma.hbm_to_vmem [thread:$0]  (!%p1402_p11), %s1397_s10, 128, %s1406_s11, %s214_s28  }
  0x6f   : > { %s232_s2 = sand.u32 1, %s1211_s20   ;;  %s236_s22 = scalar_lea.vmem [#allocation9], %s1388_s30 }
  0x70   : > { %s244_s14 = sshll.u32 %s236_s22, 4  ;;  %s233_s8 = scalar_lea.sflag [#allocation10], %s232_s2  ;;  %s245_s14 = int_to_ptr.vmem [resolvable:$true] %s244_s14 }
  0x71   : > { %s1087_s9 = scalar_lea.hbm %s1411_s26, 128  ;;  %s1092_s6 = scalar_lea.hbm %s1556_s1, 256 }
  0x72   : > { %p1088_p4 = scmp.ne.s32.totalorder %s1411_s26, %s1087_s9  ;;  %p1093_p5 = scmp.lt.u32.totalorder %s1411_s26, %s1556_s1 }
  0x73   : > { %p1094_p7 = scmp.lt.u32.totalorder %s1092_s6, %s1087_s9  ;;  %p1096_p0 = scmp.lt.u32.totalorder %s1087_s9, %s1411_s26 }
  0x74   : > { %p1090_p9 = pnand %p1088_p4, %p1059_p2 }
  0x75   : > { %p1095_p12 = por %p1094_p7, %p1093_p5 }
  0x76   : > { %p1091_p13 = pneg %p1090_p9 }
  0x77   : > { %p1097_p1 = por %p1096_p0, %p1095_p12 }
  0x79   : > { %p1098_p6 = pnand %p1097_p1, %p1091_p13 }
  0x7b   : > { %1101 = shalt.err (!%p1098_p6)
}
  0x7c   : > { %s1102_s30 = scalar_lea.vmem %s245_s14, 128  ;;  %s1220_s10 = smov [#allocation9]  }
  0x7d   : > { %p1103_p10 = scmp.ne.s32.totalorder %s245_s14, %s1102_s30  ;;  %s1107_s11 = sshll.u32 %s1220_s10, 4  ;;  %s1108_s11 = int_to_ptr.vmem [resolvable:$false] %s1107_s11 }
  0x7e   : > { %s1109_s28 = scalar_lea.vmem %s1108_s11, 256  ;;  %p1110_p9 = scmp.lt.s32.totalorder %s245_s14, %s1108_s11 }
  0x7f   : > { %p1105_p3 = pnand %p1103_p10, %p1059_p2  ;;  %p1111_p8 = scmp.lt.s32.totalorder %s1109_s28, %s1102_s30 }
  0x81   : > { %p1106_p4 = pneg %p1105_p3  ;;  %p1112_p5 = por %p1111_p8, %p1110_p9 }
  0x83   : > { %p1113_p7 = pnand %p1112_p5, %p1106_p4 }
  0x85   : > { %1116 = shalt.err (!%p1113_p7)
}
  0x86   : > { %923 = dma.hbm_to_vmem [thread:$0]  (!%p1402_p11), %s1411_s26, 128, %s245_s14, %s233_s8  }
  0x87   : > { %p1577_p13 = scmp.ne.s32.totalorder %s1569_s25, 0 }
  0x88   : > { %s1462_s2 = sand.u32 (!%p1577_p13), 1, %s1195_s16   ;;  %p1578_p8 = scmp.ne.s32.totalorder (!%p1577_p13), %s1567_s23, 0 }
  0x89   : > { %253 = sbr.rel (%p1577_p13) target bundleno = 1191 (0x4a7), region = 36  ;;  %s1465_s22 = sshll.u32 (!%p1577_p13), %s1462_s2, 3 }
  0x8a   : > { %s256_s9 = scalar_lea.sflag (!%p1577_p13), [#allocation7], %s1462_s2  ;;  %s259_s27 = scalar_lea.vmem (!%p1577_p13), [#allocation6], %s1465_s22 }
  0x90   : > { %1170 = dma.done.wait (%p1578_p8), %s256_s9, 128  }
  0x91   : > { %1172 = vsyncadd (%p1578_p8), %s256_s9, 4294967168  ;;  %s264_s25 = sand.u32 1, %s1283_s21   ;;  %s268_s26 = scalar_lea.vmem [#allocation9], %s1465_s22 }
  0x92   : > { %s265_s12 = scalar_lea.sflag [#allocation10], %s264_s25 }
  0x93   : > { %1174 = dma.done.wait (%p1578_p8), %s265_s12, 128  }
  0x94   : > { %1176 = vsyncadd (%p1578_p8), %s265_s12, 4294967168  ;;  %p1579_p11 = scmp.eq.s32.totalorder %s1283_s21, 0 }
  0x96   : > { %1178 = dma.done.wait (%p1579_p11), [#allocation10], 512   ;;  %p1580_p2 = pmov %p1579_p11 }
  0x98   : > { %1180 = vsyncadd (%p1580_p2), [#allocation10], 4294966784  ;;  %p1581_p12 = pmov %p1580_p2 }
  0x99   : > { %p1582_p0 = pmov %p1580_p2 }
  0x9a   : > { %1182 = dma.done.wait (%p1581_p12), [#allocation13], 1024  }
  0x9b   : > { %1184 = vsyncadd (%p1582_p0), [#allocation13], 4294966272  ;;  %v1221_v0 = vmov 0.0|0.0   ;;  %v1222_v1 = vmov 0.0   ;;  %vm1223_vm0 = vmmov 0   ;;  %v404_v2 = vld [vmem:[#allocation12 + $0x8] sm:$0xff]  ;;  %v557_v28 = vlaneseq }
  0x9c   : > { %882 = vmatprep.subr.bf16.mxu0 %v1221_v0  ;;  %479 = vmatprep.mubr.f32.mxu1 %v1222_v1  ;;  %v406_v3 = vld [vmem:[#allocation12 + $0x18] sm:$0xff]  ;;  %v403_v4 = vld [vmem:[#allocation12] sm:$0xff]  ;;  %v405_v6 = vld [vmem:[#allocation12 + $0x10] sm:$0xff]  ;;  %vm315_vm1 = vcmask 261120   ;;  %vm391_vm2 = vcmask 7168   ;;  %v1224_v27 = vmov -inf  }
  0x9d   : > { %869 = vmatprep.mubr.msk.f32.mxu0 %vm1223_vm0, %v1222_v1  ;;  %v888_v5 = vpack.c.bf16 %v406_v3, %v404_v2  ;;  %v311_v7 = vld [vmem:[#allocation11] sm:$0xff]  ;;  %v312_v8 = vld [vmem:[#allocation11 + $0x8] sm:$0xff]  ;;  %v890_v9 = vpack.c.bf16 %v405_v6, %v403_v4  ;;  %v410_v12 = vld [vmem:[#allocation12 + $0x38] sm:$0xff]  ;;  %392 = vst.msk [vmem:[#allocation3] sm:$0xff] %vm391_vm2, %v1224_v27  ;;  %v558_v29 = vshrl.u32 %v557_v28, 7  ;;  %v562_v30 = vand.u32 127, %v557_v28 }
  0x9e   : > { %v883_v10 = vpack.c.bf16 %v312_v8, %v311_v7  ;;  %v408_v11 = vld [vmem:[#allocation12 + $0x28] sm:$0xff]  ;;  %v407_v13 = vld [vmem:[#allocation12 + $0x20] sm:$0xff]  ;;  %v409_v15 = vld [vmem:[#allocation12 + $0x30] sm:$0xff]  ;;  %393 = vst.msk [vmem:[#allocation4] sm:$0xff] %vm391_vm2, %v1222_v1  ;;  %vm568_vm4 = vcmask 64512   ;;  %v1225_v35 = vmov 0  }
  0x9f   : > { %889 = vmatprep.subr.bf16.mxu1 %v888_v5  ;;  %v892_v14 = vpack.c.bf16 %v410_v12, %v408_v11  ;;  %v313_v16 = vld [vmem:[#allocation11 + $0x10] sm:$0xff]  ;;  %v314_v17 = vld [vmem:[#allocation11 + $0x18] sm:$0xff]  ;;  %v894_v18 = vpack.c.bf16 %v409_v15, %v407_v13  ;;  %v310_v21 = vld [vmem:[%s259_s27] sm:$0xff]  ;;  %vm565_vm3 = vcmp.le.s32.totalorder %v562_v30, %v558_v29  ;;  %993 = vset.pattern.permute.xlu0 %v1225_v35  ;;  %s849_s21 = sshll.u32 %s1203_s18, 7  ;;  %s305_s23 = scalar_lea.vmem [#allocation14], %s1465_s22 }
  0xa0   : > { %891 = vmatpush1.bf16.msra.mxu1 %v890_v9  ;;  %884 = vmatpush3.bf16.msra.mxu0 %v883_v10  ;;  %v886_v19 = vpack.c.bf16 %v314_v17, %v313_v16  ;;  %v402_v20 = vld [vmem:[%s268_s26] sm:$0xff]  ;;  %s703_s14 = sshll.u32 %s305_s23, 4  ;;  %s1506_s6 = scalar_lea.hbm %s1559_s4, %s849_s21  ;;  %s1508_s14 = int_to_ptr.vmem [resolvable:$true] %s703_s14 }
  0xa1   : > { %893 = vmatprep.subr.bf16.mxu1 %v892_v14  ;;  %885 = vmatprep.subr.bf16.mxu0 %v1221_v0  ;;  %s689_s13 = scalar_lea.sflag [#allocation8], %s1462_s2  ;;  %s1117_s3 = scalar_lea.vmem %s1508_s14, 128 }
  0xa2   : > { %994 = vset.pattern.permute.xlu1 %v1225_v35  ;;  %p1118_p1 = scmp.ne.s32.totalorder %s1508_s14, %s1117_s3  ;;  %p1583_p6 = scmp.ne.s32.totalorder %s1575_s29, 0 }
  0xa3   : > { %s1226_s18 = smov [#allocation14]  }
  0xa4   : > { %895 = vmatpush1.bf16.msra.mxu1 %v894_v18  ;;  %887 = vmatpush3.bf16.msra.mxu0 %v886_v19  ;;  %v567_v36 = vld [vmem:[#allocation3] sm:$0xff]  ;;  %p1119_p10 = pnand %p1118_p1, %p1583_p6  ;;  %s1121_s30 = sshll.u32 %s1226_s18, 4  ;;  %s1122_s30 = int_to_ptr.vmem [resolvable:$false] %s1121_s30 }
  0xa5   : > { %872 = vmatprep.subr.mxu0 %v1222_v1  ;;  %877 = vmatprep.subr.mxu1 %v1222_v1  ;;  %v584_v47 = vld [vmem:[#allocation4] sm:$0xff]  ;;  %s1123_s10 = scalar_lea.vmem %s1122_s30, 256  ;;  %p1124_p4 = scmp.lt.s32.totalorder %s1508_s14, %s1122_s30 }
  0xa6   : > { %p1120_p3 = pneg %p1119_p10  ;;  %p1125_p9 = scmp.lt.s32.totalorder %s1123_s10, %s1117_s3 }
  0xa7   : > { %846 = vmatmul.mubr.msk.f32.vlgmr.msra.gmra.mrb[0].mxu1 %vm315_vm1, %v402_v20  ;;  %870 = vmatmul.mubr.msk.f32.vlgmr.msra.gmra.mrb[0].mxu0 %vm315_vm1, %v310_v21 }
  0xa8   : > { %874 = vmatprep.mubr.msk.f32.mxu0 %vm1223_vm0, %v1222_v1  ;;  %879 = vmatprep.mubr.msk.f32.mxu1 %vm1223_vm0, %v1222_v1  ;;  %p1126_p5 = por %p1125_p9, %p1124_p4 }
  0xaa   : > { %p1127_p7 = pnand %p1126_p5, %p1120_p3 }
 0x17a   : > { %v481_v22 = vpop.f32.mrb[0].mxu1  ;;  %v385_v23 = vpop.f32.mrb[0].mxu0 }
 0x17b   : > { %v389_v24 = vmul.f32 0.25, %v385_v23  ;;  %v483_v25 = vpop.f32.mrb[1].mxu1  ;;  %873 = vmatpush3.xpose.msra.mxu0 %v481_v22  ;;  %v871_v26 = vpop.f32.mrb[1].mxu0 }
 0x17c   : > { %878 = vmatpush3.msra.mxu1 %v483_v25 }
 0x17e   : > { %875 = vmatmul.mubr.f32.vlgmr.msra.gmra.mrb[2].mxu0 %v389_v24 }
 0x251   : > { %v553_v31 = vpop.f32.mrb[2].mxu0 }
 0x252   : > { %v566_v32 = vsel %vm565_vm3, %v553_v31, -inf  ;;  %v876_v33 = vpop.f32.mrb[3].mxu0 }
 0x253   : > { %v569_v34 = vsel %vm568_vm4, %v566_v32, -inf }
 0x254   : > { %570 = vmax.xlane.f32.xlu0 %v569_v34 }
 0x2e1   : > { %v571_v37 = vpop.xlane.xlu0 %570 }
 0x2e2   : > { %v572_v38 = vmax.f32 %v567_v36, %v571_v37 }
 0x2e4   : > { %v573_v39 = vsub.f32 %v567_v36, %v572_v38  ;;  %674 = vst.msk [vmem:[#allocation3] sm:$0xff] %vm391_vm2, %v572_v38  ;;  %578 = vperm.xlu0 %993, %v572_v38  }
 0x2e6   : > { %v574_v45 = vmul.f32 1.442695, %v573_v39 }
 0x363   : > { %v579_v40 = vpop.permute.xlu0 %578 }
 0x364   : > { %v581_v41 = vsub.f32 %v566_v32, %v579_v40 }
 0x366   : > { %v582_v42 = vmul.f32 1.442695, %v581_v41 }
 0x368   : > { %995 = vpow2.f32 %v582_v42 }
 0x369   : > { %997 = vpow2.f32 %v574_v45 }
 0x372   : > { %v996_v43 = vpop.eup %995 }
 0x373   : > { %880 = vmatmul.mubr.msk.f32.vlgmr.msra.gmra.mrb[2].mxu1 %vm568_vm4, %v996_v43  ;;  %v586_v44 = vsel %vm568_vm4, %v996_v43, 0.0  ;;  %v998_v46 = vpop.eup %997 }
 0x374   : > { %587 = vadd.xlane.f32.xlu1 %v586_v44  ;;  %v585_v48 = vmul.f32 %v998_v46, %v584_v47 }
 0x385   : > { %595 = vperm.xlu1 %994, %v998_v46  }
 0x401   : > { %v588_v49 = vpop.xlane.xlu1 %587 }
 0x402   : > { %v589_v50 = vadd.f32 %v588_v49, %v585_v48 }
 0x404   : > { %591 = vst.msk [vmem:[#allocation4] sm:$0xff] %vm391_vm2, %v589_v50 }
 0x405   : > { %v596_v55 = vpop.permute.xlu1 %595 }
 0x406   : > { %v598_v56 = vmul.f32 0.0, %v596_v55 }
 0x40b   : > { %v678_v51 = vld [vmem:[#allocation4] sm:$0xff] }
 0x40c   : > { %999 = vrcp.f32 %v678_v51 }
 0x416   : > { %v1000_v52 = vpop.eup %999 }
 0x417   : > { %683 = vperm.xlu1 %994, %v1000_v52  }
 0x446   : > { %v668_v53 = vpop.f32.mrb[2].mxu1 }
 0x447   : > { %v881_v54 = vpop.f32.mrb[3].mxu1  ;;  %v672_v57 = vadd.f32 %v668_v53, %v598_v56 }
 0x496   : > { %v684_v58 = vpop.permute.xlu1 %683 }
 0x497   : > { %v686_v59 = vmul.f32 %v684_v58, %v672_v57 }
 0x499   : > { %687 = vst [vmem:[%s305_s23] sm:$0xff] %v686_v59 }
 0x49a   : > { %1130 = shalt.err (!%p1127_p7)
}
 0x49b   : > { %s1131_s11 = scalar_lea.hbm %s1506_s6, 128  ;;  %s1135_s22 = scalar_lea.hbm %s1559_s4, 256 }
 0x49c   : > { %p1132_p13 = scmp.ne.s32.totalorder %s1506_s6, %s1131_s11  ;;  %p1136_p2 = scmp.lt.u32.totalorder %s1506_s6, %s1559_s4 }
 0x49d   : > { %p1137_p12 = scmp.lt.u32.totalorder %s1135_s22, %s1131_s11  ;;  %p1139_p1 = scmp.lt.u32.totalorder %s1131_s11, %s1506_s6 }
 0x49e   : > { %p1133_p8 = pnand %p1132_p13, %p1583_p6 }
 0x49f   : > { %p1138_p0 = por %p1137_p12, %p1136_p2 }
 0x4a0   : > { %p1134_p11 = pneg %p1133_p8 }
 0x4a1   : > { %p1140_p10 = por %p1139_p1, %p1138_p0 }
 0x4a3   : > { %p1141_p3 = pnand %p1140_p10, %p1134_p11 }
 0x4a5   : > { %1144 = shalt.err (!%p1141_p3)
}
 0x4a6   : > { %908 = dma.vmem_to_hbm [thread:$0]  (%p1583_p6), %s1508_s14, 128, %s1506_s6, %s689_s13  }
 0x4a7 PF: > { %s715_s25 = sand.u32 1, %s1191_s15   ;;  %p1584_p4 = scmp.ne.s32.totalorder %s1568_s24, 0 }
 0x4a8   : > { %p1585_p9 = scmp.ge.s32.totalorder %s1211_s20, 2  ;;  %s716_s12 = scalar_lea.sflag [#allocation8], %s715_s25 }
 0x4aa   : > { %p925_p5 = pnand %p1585_p9, %p1584_p4 }
 0x4ac   : > { %1186 = dma.done.wait (!%p925_p5), %s716_s12, 128  }
 0x4ad   : > { %1188 = vsyncadd (!%p925_p5), %s716_s12, 4294967168  ;;  %s24_s20 = sadd.s32 1, %s1211_s20   ;;  %s1586_s29 = sld [smem:[#allocation20_spill]] }
 0x4ae   : > { %p21_p7 = scmp.ge.s32.totalorder %s24_s20, 4   ;;  %s1587_s15 = smov %s1195_s16 }
 0x4af   : > { %s1588_s16 = smov %s1199_s17  ;;  %s1589_s17 = smov %s1392_s7 }
 0x4b0   : > { %s1590_s18 = smov %s1207_s19  ;;  %23 = sbr.rel (!%p21_p7) target bundleno = 12 (0xc), region = 114 }
 0x4b3   : > { %s1591_s19 = smov %s1586_s29 }
 0x4b7   :  { %721 = vsyncpa [#allocation7], 1 }
 0x4b8   :  { %723 = vsyncpa [#allocation7 + $0x1], 1 }
 0x4b9   :  { %724 = vsyncpa [#allocation10], 1 }
 0x4ba   :  { %726 = vsyncpa [#allocation10 + $0x1], 1 }
 0x4bb   :  { %727 = vsyncpa [#allocation13], 1 }
 0x4bc   :  { %728 = vsyncpa [#allocation8], 1 }
 0x4bd   :  { %730 = vsyncpa [#allocation8 + $0x1], 1 }

</bundles_post_ra>
